<compile_context>
chip_gen: v7x
topology: tpu7x:2x2x1
jax: 0.10.0
libtpu: 0.0.40
codegen_flags: <defaults>
</compile_context>

<pallas_src>
import jax
import jax.numpy as jnp
from jax.experimental import pallas as pl
from jax.experimental.pallas import tpu as pltpu


_TARGET_BLOCK_BYTES = 4 * 1024 * 1024   # ~4 MiB per block buffer
_MIN_SPLIT_BYTES = 2 * 1024 * 1024      # split threshold for v7x megacore
_VMEM_LIMIT_BYTES = 32 * 1024 * 1024    # explicit limit (v5e default is 16 MiB)


def _add_one_kernel(x_ref, o_ref):
    # Pure elementwise VPU work on the whole VMEM tile; HBM-bandwidth bound.
    o_ref[...] = x_ref[...] + jnp.asarray(1, dtype=o_ref.dtype)


def _sublane(itemsize: int) -> int:
    """Packed sublane granularity: 8 for 4-byte, 16 for 2-byte, 32 for 1-byte."""
    return max(8, (8 * 4) // max(itemsize, 1))


def _pick_block_rows(rows: int, lanes: int, itemsize: int) -> int:
    """Row-tile targeting ~4 MiB blocks, sublane-rounded; >=2 blocks for medium slabs."""
    sub = _sublane(itemsize)
    row_bytes = lanes * itemsize
    target = max(sub, (_TARGET_BLOCK_BYTES // row_bytes) // sub * sub)
    if rows > target:
        return target
    # Whole slab fits in one target block.
    if rows * row_bytes >= _MIN_SPLIT_BYTES and rows > sub:
        # v7x has 2 TensorCores sharding the "parallel" axis: give it >= 2 steps.
        half = (rows + 1) // 2
        return min(target, ((half + sub - 1) // sub) * sub)
    # Tiny input: full-extent block (allowed even if rows % sub != 0).
    return rows


def _cost_estimate(n: int, itemsize: int) -> pl.CostEstimate:
    return pl.CostEstimate(flops=n, transcendentals=0,
                           bytes_accessed=2 * n * itemsize)


def _compiler_params() -> pltpu.CompilerParams:
    return pltpu.CompilerParams(
        dimension_semantics=("parallel",),
        vmem_limit_bytes=_VMEM_LIMIT_BYTES,
    )


def _run_add_one_2d(slab: jax.Array, block_rows: int, *, in_place: bool) -> jax.Array:
    rows, lanes = slab.shape
    itemsize = jnp.dtype(slab.dtype).itemsize
    return pl.pallas_call(
        _add_one_kernel,
        out_shape=jax.ShapeDtypeStruct((rows, lanes), slab.dtype),
        grid_spec=pltpu.PrefetchScalarGridSpec(
            num_scalar_prefetch=0,
            grid=(pl.cdiv(rows, block_rows),),
            in_specs=[pl.BlockSpec((block_rows, lanes), lambda i: (i, 0))],
            out_specs=pl.BlockSpec((block_rows, lanes), lambda i: (i, 0)),
        ),
        compiler_params=_compiler_params(),
        cost_estimate=_cost_estimate(rows * lanes, itemsize),
        input_output_aliases=({0: 0} if in_place else {}),
    )(slab)


def _run_add_one_1d(flat: jax.Array, *, in_place: bool) -> jax.Array:
    """Ragged path: stream the flat array; Pallas masks the partial final block."""
    (n,) = flat.shape
    itemsize = jnp.dtype(flat.dtype).itemsize
    tile_elems = _sublane(itemsize) * 128
    block = max(tile_elems,
                (_TARGET_BLOCK_BYTES // itemsize) // tile_elems * tile_elems)
    if n <= block:
        block = n  # single full-extent block (valid for any n)
    return pl.pallas_call(
        _add_one_kernel,
        out_shape=jax.ShapeDtypeStruct((n,), flat.dtype),
        grid_spec=pltpu.PrefetchScalarGridSpec(
            num_scalar_prefetch=0,
            grid=(pl.cdiv(n, block),),
            in_specs=[pl.BlockSpec((block,), lambda i: (i,))],
            out_specs=pl.BlockSpec((block,), lambda i: (i,)),
        ),
        compiler_params=_compiler_params(),
        cost_estimate=_cost_estimate(n, itemsize),
        input_output_aliases=({0: 0} if in_place else {}),
    )(flat)


def my_model_forward(x: jax.Array, *, in_place: bool = False) -> jax.Array:
    """Computes x + 1 with a Pallas TPU kernel. Works for any shape/dtype."""
    orig_shape = x.shape
    n = x.size
    if n == 0:
        return x

    itemsize = jnp.dtype(x.dtype).itemsize

    # Fast path: widest lane width (multiple of 128) dividing n.
    lanes = None
    for cand in (1024, 512, 256, 128):
        if n % cand == 0:
            lanes = cand
            break

    if lanes is not None:
        rows = n // lanes
        block_rows = _pick_block_rows(rows, lanes, itemsize)
        slab = x.reshape(rows, lanes)            # metadata-only reshape
        out = _run_add_one_2d(slab, block_rows, in_place=in_place)
        return out.reshape(orig_shape)

    # Ragged path (n % 128 != 0): no pad/slice — HBM traffic stays at 2*N bytes.
    out = _run_add_one_1d(jnp.ravel(x), in_place=in_place)
    return out.reshape(orig_shape)


if __name__ == "__main__":
    key = jax.random.PRNGKey(0)

    # Primary test: small NCHW-shaped input consistent with the module.
    x = jax.random.normal(key, (2, 4, 16, 16), dtype=jnp.float32)
    y = my_model_forward(x)
    jax.block_until_ready(y)
    ref = x + 1.0
    assert y.shape == x.shape and y.dtype == x.dtype
    assert jnp.max(jnp.abs(y - ref)) == 0.0

    # Secondary test: small ragged size (not a multiple of 128) exercises the
    # pad-free 1-D streaming fallback.
    x2 = jax.random.normal(jax.random.PRNGKey(0), (3, 5, 7), dtype=jnp.float32)
    y2 = my_model_forward(x2)
    jax.block_until_ready(y2)
    assert y2.shape == x2.shape and y2.dtype == x2.dtype
    assert jnp.max(jnp.abs(y2 - (x2 + 1.0))) == 0.0

    print("KERNEL_OK")
</pallas_src>

<mosaic_0001>
module attributes {stable_mosaic.version = 11 : i64} {
  func.func @_add_one_kernel(%arg0: i32, %arg1: memref<2x1024xf32, #tpu.memory_space<vmem>>, %arg2: memref<2x1024xf32, #tpu.memory_space<vmem>>) attributes {dimension_semantics = [#tpu.dimension_semantics<parallel>], iteration_bounds = array<i64: 1>, scalar_prefetch = 0 : i64, scratch_operands = 0 : i64, tpu.core_type = #tpu.core_type<tc>, window_params = [{transform_indices = @transform_0, window_bounds = array<i64: 2, 1024>}, {transform_indices = @transform_1, window_bounds = array<i64: 2, 1024>}]} {
    %c0 = arith.constant 0 : index
    %c0_0 = arith.constant 0 : index
    %0 = vector.load %arg1[%c0, %c0_0] : memref<2x1024xf32, #tpu.memory_space<vmem>>, vector<2x1024xf32>
    %cst = arith.constant 1.000000e+00 : f32
    %1 = vector.broadcast %cst : f32 to vector<2x1024xf32>
    %2 = arith.addf %0, %1 : vector<2x1024xf32>
    %c0_1 = arith.constant 0 : index
    %c0_2 = arith.constant 0 : index
    %3 = vector.load %arg2[%c0_1, %c0_2] : memref<2x1024xf32, #tpu.memory_space<vmem>>, vector<2x1024xf32>
    tpu.vector_store %arg2[%c0_1, %c0_2], %2 {strides = array<i32>} : memref<2x1024xf32, #tpu.memory_space<vmem>>, vector<2x1024xf32>,
    return
  }
  func.func @transform_0(%arg0: i32) -> (i32, i32) {
    %c0_i32 = arith.constant 0 : i32
    %c0_i32_0 = arith.constant 0 : i32
    return %arg0, %c0_i32 : i32, i32
  }
  func.func @transform_1(%arg0: i32) -> (i32, i32) {
    %c0_i32 = arith.constant 0 : i32
    %c0_i32_0 = arith.constant 0 : i32
    return %arg0, %c0_i32 : i32, i32
  }
}

</mosaic_0001>

<bundles_post_ra>
// kernel: tpu_custom_call.1
= control target key start
LH: loop header
LB: loop body
LE: loop exit
PB: predicated region body
PF: predicated region fallthrough
CT: control target
= control target key end

     0   :  { %6 = vsyncpa [#allocation3], 0  ;;  %s128_s0 = inlined_call_operand.hbm [shape: f32[2,1024], index: 0, kind: input, shape index: {}]   ;;  %s129_s1 = inlined_call_operand.hbm [shape: f32[2,1024], index: 1, kind: output, shape index: {}]  }
   0x1   :  { %7 = vsyncpa [#allocation4], 0  ;;  %s92_s6 = smov [#allocation2]   ;;  %s44_s10 = scalar_lea.hbm %s128_s0, 256 }
   0x2   :  { %s14_s7 = sshll.u32 %s92_s6, 4  ;;  %p45_p0 = scmp.ne.s32.totalorder %s128_s0, %s44_s10  ;;  %s15_s7 = int_to_ptr.vmem [resolvable:$true] %s14_s7 }
   0x3   :  { %p48_p1 = scmp.lt.u32.totalorder %s44_s10, %s128_s0 }
   0x5   :  { %p50_p2 = pnand %p48_p1, %p45_p0 }
   0x7   :  { %53 = shalt.err (!%p50_p2)
}
   0x8   :  { %s54_s15 = scalar_lea.vmem %s15_s7, 256  ;;  %p59_p4 = scmp.lt.s32.totalorder %s15_s7, %s15_s7 }
   0x9   :  { %p55_p3 = scmp.ne.s32.totalorder %s15_s7, %s54_s15  ;;  %p60_p5 = scmp.lt.s32.totalorder %s54_s15, %s54_s15 }
   0xb   :  { %p61_p6 = por %p60_p5, %p59_p4 }
   0xd   :  { %p62_p7 = pnand %p61_p6, %p55_p3 }
   0xf   :  { %65 = shalt.err (!%p62_p7)
}
  0x10   :  { %17 = dma.hbm_to_vmem [thread:$0]  %s128_s0, 256, %s15_s7, [#allocation3]  }
  0x11   :  { %88 = dma.done.wait [#allocation3], 256  }
  0x12   :  { %89 = vsyncadd [#allocation3], 4294967040  ;;  %s93_s18 = smov [#allocation5]   ;;  %v21_v0 = vld [vmem:[#allocation2] sm:$0xff]  ;;  %v22_v1 = vld [vmem:[#allocation2 + $0x8] sm:$0xff] }
  0x13   :  { %s33_s19 = sshll.u32 %s93_s18, 4  ;;  %v23_v2 = vadd.f32 1.0, %v21_v0  ;;  %v24_v3 = vadd.f32 1.0, %v22_v1  ;;  %s34_s19 = int_to_ptr.vmem [resolvable:$true] %s33_s19 }
  0x14   :  { %s66_s20 = scalar_lea.vmem %s34_s19, 256  ;;  %p71_p9 = scmp.lt.s32.totalorder %s34_s19, %s34_s19 }
  0x15   :  { %25 = vst [vmem:[#allocation5] sm:$0xff] %v23_v2  ;;  %26 = vst [vmem:[#allocation5 + $0x8] sm:$0xff] %v24_v3  ;;  %p67_p8 = scmp.ne.s32.totalorder %s34_s19, %s66_s20  ;;  %p72_p10 = scmp.lt.s32.totalorder %s66_s20, %s66_s20 }
  0x17   :  { %p73_p11 = por %p72_p10, %p71_p9 }
  0x19   :  { %p74_p12 = pnand %p73_p11, %p67_p8 }
  0x1b   :  { %77 = shalt.err (!%p74_p12)
}
  0x1c   :  { %s78_s22 = scalar_lea.hbm %s129_s1, 256 }
  0x1d   :  { %p79_p13 = scmp.ne.s32.totalorder %s129_s1, %s78_s22  ;;  %p82_p0 = scmp.lt.u32.totalorder %s78_s22, %s129_s1 }
  0x1f   :  { %p84_p1 = pnand %p82_p0, %p79_p13 }
  0x21   :  { %87 = shalt.err (!%p84_p1)
}
  0x22   :  { %36 = dma.vmem_to_hbm [thread:$0]  %s34_s19, 256, %s129_s1, [#allocation4]  }
  0x23   :  { %90 = dma.done.wait [#allocation4], 256  }
  0x24   :  { %91 = vsyncadd [#allocation4], 4294967040 }
  0x25   :  { %40 = vsyncpa [#allocation3], 1 }
  0x26   :  { %41 = vsyncpa [#allocation4], 1 }

</bundles_post_ra>
